<compile_context>
chip_gen: v7x
topology: tpu7x:2x2x1
jax: 0.10.0
libtpu: 0.0.40
codegen_flags: <defaults>
</compile_context>

<pallas_src>
import functools

import numpy as np
import jax
import jax.numpy as jnp
from jax.experimental import pallas as pl
from jax.experimental.pallas import tpu as pltpu


# ----------------------------- parameter setup (plain numpy, deterministic) ----
def pad_center(data, size):
    n = data.shape[-1]
    lpad = int((size - n) // 2)
    lengths = [(0, 0)] * data.ndim
    lengths[-1] = (lpad, int(size - n - lpad))
    return np.pad(data, lengths)


def hann_window_periodic(win_length):
    # scipy.signal.get_window('hann', N, fftbins=True)
    n = np.arange(win_length)
    return 0.5 - 0.5 * np.cos(2.0 * np.pi * n / win_length)


def make_forward_basis(filter_length, win_length, window="hann"):
    assert window == "hann"
    fourier_basis = np.fft.fft(np.eye(filter_length))
    cutoff = int(filter_length / 2 + 1)
    fourier_basis = np.vstack(
        [np.real(fourier_basis[:cutoff, :]), np.imag(fourier_basis[:cutoff, :])]
    )  # (2*cutoff, filter_length)
    fft_window = hann_window_periodic(win_length)
    fft_window = pad_center(fft_window, filter_length)  # (filter_length,)
    forward_basis = (fourier_basis * fft_window[None, :]).astype(np.float32)
    w_real = forward_basis[:cutoff, :]  # (cutoff, filter_length)
    w_imag = forward_basis[cutoff:, :]  # (cutoff, filter_length)
    return w_real, w_imag, cutoff


# ----------------------------- in-kernel atan2 ----------------------------------
_SIGN_MASK = np.int32(-(2 ** 31))   # 0x80000000


def _atan2(y, x):
    """atan2 from VPU/EUP-friendly primitives (A&S 4.4.49 poly, |err| <= ~1e-5 rad).

    The divide is an EUP reciprocal (+1 Newton step) and the final sign flip is a
    sign-bit transfer from y, which also reproduces torch.atan2's signed-zero
    behaviour at the +/-pi branch cut.
    """
    ax = jnp.abs(x)
    ay = jnp.abs(y)
    amax = jnp.maximum(ax, ay)
    amin = jnp.minimum(ax, ay)
    safe = jnp.where(amax == 0.0, 1.0, amax)
    inv = pl.reciprocal(safe, approx=True)       # EUP slot
    inv = inv * (2.0 - safe * inv)               # one Newton step (cheap, exact-ish)
    t = amin * inv                               # in [0, 1]
    s = t * t
    p = ((((0.0208351 * s - 0.0851330) * s + 0.1801410) * s
          - 0.3302995) * s + 0.9998660) * t      # atan(t), t in [0, 1]
    r = jnp.where(ay > ax, (np.pi / 2.0) - p, p)  # octant fixup
    r = jnp.where(x < 0.0, np.pi - r, r)          # r in [0, pi]
    sign_bits = pltpu.bitcast(y, jnp.int32) & _SIGN_MASK
    return pltpu.bitcast(pltpu.bitcast(r, jnp.int32) | sign_bits, jnp.float32)


# ----------------------------- Pallas kernel ------------------------------------
def stft_kernel(x_ref, halo_ref, w_ref, mag_ref, phase_ref, *, cutoff, c_pad):
    # x_ref:    (hop, TT)      corner-turned signal: x[q, m] = x_pad[m*hop + q]
    # halo_ref: (hop, r-1)     the first r-1 columns of the NEXT tile
    # w_ref:    (2*c_pad, K)   concatenated (real | imag) windowed Fourier basis
    main = x_ref[...]
    halo = halo_ref[...]
    hop, frame_tile = main.shape
    k = w_ref.shape[1]
    r = k // hop

    # Build the (K, TT) frame matrix entirely in VMEM (lane shifts on the XLU):
    # frames[a*hop + q, t] = x_pad[(t + a)*hop + q]
    full = jnp.concatenate([main, halo], axis=1)                      # (hop, TT + r - 1)
    frames = jnp.concatenate(
        [full[:, a:a + frame_tile] for a in range(r)], axis=0)        # (K, TT)

    s = jnp.dot(w_ref[...], frames,
                preferred_element_type=jnp.float32)                   # (2*c_pad, TT)
    re = s[:cutoff, :]
    im = s[c_pad:c_pad + cutoff, :]
    mag_ref[...] = jnp.sqrt(re * re + im * im)
    phase_ref[...] = _atan2(im, re)


# ----------------------------- tiling heuristics ---------------------------------
def _round_up(v, m):
    return -(-v // m) * m


def _choose_frame_tile(num_frames, batch, *, max_tile=8192, min_programs=4):
    """Frame-tile (lane) size: as large as possible, but keep the grid populated
    so both v7x TensorCores get work, and keep tiled blocks 128-aligned."""
    if num_frames <= 256:
        return num_frames                      # tiny problem: one full tile / batch
    if num_frames <= max_tile and batch >= min_programs:
        return num_frames                      # one full tile / batch, enough programs
    tile = min(max_tile, _round_up(num_frames, 128))
    while batch * (-(-num_frames // tile)) < min_programs and tile > 128:
        tile = max(128, _round_up(tile // 2, 128))
    return tile


# ----------------------------- wrapper -------------------------------------------
def stft_forward(input_data, filter_length=16, hop_length=8, win_length=None,
                 window="hann", max_frame_tile=8192):
    """input_data: (num_batch, num_samples) float32.
    Returns (magnitude, phase), each (num_batch, cutoff, num_frames)."""
    win_length = win_length if win_length else filter_length
    assert filter_length % hop_length == 0 and filter_length >= 2 * hop_length, (
        "kernel assumes hop_length divides filter_length (e.g. 50% overlap)")
    hop = hop_length
    K = filter_length
    r = K // hop                              # hop-blocks per frame (2 for 50% overlap)
    pad_amount = K // 2

    w_real_np, w_imag_np, cutoff = make_forward_basis(K, win_length, window)
    c_pad = -(-cutoff // 8) * 8               # sublane-aligned real/imag split
    w_cat = np.zeros((2 * c_pad, K), np.float32)
    w_cat[:cutoff] = w_real_np
    w_cat[c_pad:c_pad + cutoff] = w_imag_np

    x = jnp.asarray(input_data, jnp.float32)
    B, _ = x.shape

    # reflect pad (same as F.pad(..., mode='reflect') on the last dim)
    x_pad = jnp.pad(x, ((0, 0), (pad_amount, pad_amount)), mode="reflect")
    L = x_pad.shape[-1]
    T = (L - K) // hop + 1                    # number of STFT frames

    TT = _choose_frame_tile(T, B, max_tile=max_frame_tile)
    n_tiles = pl.cdiv(T, TT)

    # Corner-turn the padded signal once (1x data): x_ct[b, q, m] = x_pad[b, m*hop + q].
    total_cols = n_tiles * TT + (r - 1)
    x_pad = jnp.pad(x_pad, ((0, 0), (0, total_cols * hop - L)))
    x_ct = jnp.transpose(x_pad.reshape(B, total_cols, hop), (0, 2, 1))  # (B, hop, cols)
    x_main = x_ct[:, :, :n_tiles * TT]                                  # (B, hop, n_tiles*TT)
    # Tiny halo: the first (r-1) columns of the NEXT tile, for the last frames of each tile.
    halo_cols = (np.arange(1, n_tiles + 1) * TT)[:, None] + np.arange(r - 1)[None, :]
    x_halo = jnp.transpose(x_ct[:, :, jnp.asarray(halo_cols, np.int32)],
                           (0, 2, 1, 3))                                # (B, n_tiles, hop, r-1)

    kernel = functools.partial(stft_kernel, cutoff=cutoff, c_pad=c_pad)
    magnitude, phase = pl.pallas_call(
        kernel,
        out_shape=(
            jax.ShapeDtypeStruct((B, cutoff, T), jnp.float32),  # magnitude
            jax.ShapeDtypeStruct((B, cutoff, T), jnp.float32),  # phase
        ),
        grid=(B, n_tiles),
        in_specs=[
            pl.BlockSpec((None, hop, TT), lambda b, j: (b, 0, j)),
            pl.BlockSpec((None, None, hop, r - 1), lambda b, j: (b, j, 0, 0)),
            pl.BlockSpec((2 * c_pad, K), lambda b, j: (0, 0)),           # resident weights
        ],
        out_specs=(
            pl.BlockSpec((None, cutoff, TT), lambda b, j: (b, 0, j)),
            pl.BlockSpec((None, cutoff, TT), lambda b, j: (b, 0, j)),
        ),
        compiler_params=pltpu.CompilerParams(
            dimension_semantics=("parallel", "parallel"),
            vmem_limit_bytes=32 * 1024 * 1024),
    )(x_main, x_halo, jnp.asarray(w_cat))

    return magnitude, phase


# ----------------------------- reference (pure numpy, float64) -------------------
def stft_reference(input_data, filter_length=16, hop_length=8, win_length=None,
                   window="hann"):
    win_length = win_length if win_length else filter_length
    pad_amount = filter_length // 2
    w_real, w_imag, cutoff = make_forward_basis(filter_length, win_length, window)
    x = np.asarray(input_data, np.float64)
    x_pad = np.pad(x, ((0, 0), (pad_amount, pad_amount)), mode="reflect")
    L = x_pad.shape[-1]
    T = (L - filter_length) // hop_length + 1
    idx = np.arange(T)[:, None] * hop_length + np.arange(filter_length)[None, :]
    frames = x_pad[:, idx]                                   # (B, T, K)
    r = frames @ w_real.astype(np.float64).T                 # (B, T, C)
    i = frames @ w_imag.astype(np.float64).T
    mag = np.sqrt(r * r + i * i).transpose(0, 2, 1)
    phase = np.arctan2(i, r).transpose(0, 2, 1)
    return mag, phase


def _check(x, mag, phase, filter_length, hop_length):
    mag_ref, phase_ref = stft_reference(np.asarray(x), filter_length, hop_length)
    assert mag.shape == mag_ref.shape and phase.shape == phase_ref.shape
    np.testing.assert_allclose(np.asarray(mag), mag_ref, rtol=1e-4, atol=1e-4)
    # Phase is only defined modulo 2*pi; at the +/-pi branch cut (analytically zero
    # imaginary part) float32 vs float64 rounding legitimately flips the sign of the
    # tiny imaginary part, so compare the WRAPPED angular difference.
    dphi = np.asarray(phase, np.float64) - phase_ref
    dphi = (dphi + np.pi) % (2.0 * np.pi) - np.pi
    np.testing.assert_allclose(dphi, np.zeros_like(dphi), atol=5e-3)


if __name__ == "__main__":
    key = jax.random.PRNGKey(0)
    filter_length, hop_length = 16, 8
    k1, k2 = jax.random.split(key)

    # Small case consistent with the module: batch=2, 64 samples -> 9 freqs x 9 frames.
    x_small = jax.random.normal(k1, (2, 64), dtype=jnp.float32)
    mag_s, ph_s = stft_forward(x_small, filter_length=filter_length,
                               hop_length=hop_length)
    jax.block_until_ready((mag_s, ph_s))
    assert mag_s.shape == (2, filter_length // 2 + 1, 9)
    _check(x_small, mag_s, ph_s, filter_length, hop_length)

    # Medium case exercising the tiled path (halo across tiles + masked last block).
    x_med = jax.random.normal(k2, (2, 4096), dtype=jnp.float32)
    mag_m, ph_m = stft_forward(x_med, filter_length=filter_length,
                               hop_length=hop_length)
    jax.block_until_ready((mag_m, ph_m))
    _check(x_med, mag_m, ph_m, filter_length, hop_length)

    print("KERNEL_OK")
</pallas_src>

<mosaic_0001>
module attributes {stable_mosaic.version = 11 : i64} {
  func.func @stft_kernel(%arg0: i32, %arg1: i32, %arg2: memref<1x8x9xf32, #tpu.memory_space<vmem>>, %arg3: memref<1x1x8x1xf32, #tpu.memory_space<vmem>>, %arg4: memref<32x16xf32, #tpu.memory_space<vmem>>, %arg5: memref<1x9x9xf32, #tpu.memory_space<vmem>>, %arg6: memref<1x9x9xf32, #tpu.memory_space<vmem>>) attributes {dimension_semantics = [#tpu.dimension_semantics<parallel>, #tpu.dimension_semantics<parallel>], iteration_bounds = array<i64: 2, 1>, scalar_prefetch = 0 : i64, scratch_operands = 0 : i64, tpu.core_type = #tpu.core_type<tc>, window_params = [{transform_indices = @transform_0, window_bounds = array<i64: 1, 8, 9>}, {transform_indices = @transform_1, window_bounds = array<i64: 1, 1, 8, 1>}, {pipeline_mode = #tpu.pipeline_mode<synchronous>, transform_indices = @transform_2, window_bounds = array<i64: 32, 16>}, {transform_indices = @transform_3, window_bounds = array<i64: 1, 9, 9>}, {transform_indices = @transform_4, window_bounds = array<i64: 1, 9, 9>}]} {
    %c0 = arith.constant 0 : index
    %c0_0 = arith.constant 0 : index
    %c0_1 = arith.constant 0 : index
    %0 = vector.load %arg2[%c0, %c0_0, %c0_1] : memref<1x8x9xf32, #tpu.memory_space<vmem>>, vector<1x8x9xf32>
    %1 = vector.shape_cast %0 : vector<1x8x9xf32> to vector<8x9xf32>
    %c0_2 = arith.constant 0 : index
    %c0_3 = arith.constant 0 : index
    %c0_4 = arith.constant 0 : index
    %c0_5 = arith.constant 0 : index
    %2 = vector.load %arg3[%c0_2, %c0_3, %c0_4, %c0_5] : memref<1x1x8x1xf32, #tpu.memory_space<vmem>>, vector<1x1x8x1xf32>
    %3 = vector.shape_cast %2 : vector<1x1x8x1xf32> to vector<8x1xf32>
    %4 = tpu.concatenate %1, %3 in 1 : vector<8x9xf32>, vector<8x1xf32> -> vector<8x10xf32>
    %5 = vector.extract_strided_slice %4 {offsets = [0, 0], sizes = [8, 9], strides = [1, 1]} : vector<8x10xf32> to vector<8x9xf32>
    %6 = vector.extract_strided_slice %4 {offsets = [0, 1], sizes = [8, 9], strides = [1, 1]} : vector<8x10xf32> to vector<8x9xf32>
    %7 = tpu.concatenate %5, %6 in 0 : vector<8x9xf32>, vector<8x9xf32> -> vector<16x9xf32>
    %c0_6 = arith.constant 0 : index
    %c0_7 = arith.constant 0 : index
    %8 = vector.load %arg4[%c0_6, %c0_7] : memref<32x16xf32, #tpu.memory_space<vmem>>, vector<32x16xf32>
    %cst = arith.constant dense<0.000000e+00> : vector<32x9xf32>
    %9 = tpu.matmul %8, %7, %cst {dimension_numbers = #tpu.dot_dimension_numbers<[1], [0], [0], [1], [0, 0, 1, 1], [], []>} : vector<32x16xf32>, vector<16x9xf32>, vector<32x9xf32> -> vector<32x9xf32>
    %10 = vector.extract_strided_slice %9 {offsets = [0, 0], sizes = [9, 9], strides = [1, 1]} : vector<32x9xf32> to vector<9x9xf32>
    %11 = vector.extract_strided_slice %9 {offsets = [16, 0], sizes = [9, 9], strides = [1, 1]} : vector<32x9xf32> to vector<9x9xf32>
    %12 = arith.mulf %10, %10 : vector<9x9xf32>
    %13 = arith.mulf %11, %11 : vector<9x9xf32>
    %14 = arith.addf %12, %13 : vector<9x9xf32>
    %15 = math.sqrt %14 : vector<9x9xf32>
    %c0_8 = arith.constant 0 : index
    %c0_9 = arith.constant 0 : index
    %c0_10 = arith.constant 0 : index
    %16 = vector.load %arg5[%c0_8, %c0_9, %c0_10] : memref<1x9x9xf32, #tpu.memory_space<vmem>>, vector<1x9x9xf32>
    %17 = vector.shape_cast %16 : vector<1x9x9xf32> to vector<9x9xf32>
    %18 = vector.shape_cast %15 : vector<9x9xf32> to vector<1x9x9xf32>
    tpu.vector_store %arg5[%c0_8, %c0_9, %c0_10], %18 {strides = array<i32>} : memref<1x9x9xf32, #tpu.memory_space<vmem>>, vector<1x9x9xf32>,
    %19 = math.absf %10 : vector<9x9xf32>
    %20 = math.absf %11 : vector<9x9xf32>
    %21 = arith.maximumf %19, %20 : vector<9x9xf32>
    %22 = arith.minimumf %19, %20 : vector<9x9xf32>
    %cst_11 = arith.constant 0.000000e+00 : f32
    %23 = vector.broadcast %cst_11 : f32 to vector<9x9xf32>
    %24 = arith.cmpf oeq, %21, %23 : vector<9x9xf32>
    %cst_12 = arith.constant 1.000000e+00 : f32
    %25 = vector.broadcast %cst_12 : f32 to vector<9x9xf32>
    %26 = arith.select %24, %25, %21 : vector<9x9xi1>, vector<9x9xf32>
    %27 = tpu.reciprocal %26 {approx = true} : vector<9x9xf32> -> vector<9x9xf32>
    %28 = arith.mulf %26, %27 : vector<9x9xf32>
    %cst_13 = arith.constant 2.000000e+00 : f32
    %29 = vector.broadcast %cst_13 : f32 to vector<9x9xf32>
    %30 = arith.subf %29, %28 : vector<9x9xf32>
    %31 = arith.mulf %27, %30 : vector<9x9xf32>
    %32 = arith.mulf %22, %31 : vector<9x9xf32>
    %33 = arith.mulf %32, %32 : vector<9x9xf32>
    %cst_14 = arith.constant 2.083510e-02 : f32
    %34 = vector.broadcast %cst_14 : f32 to vector<9x9xf32>
    %35 = arith.mulf %34, %33 : vector<9x9xf32>
    %cst_15 = arith.constant 8.513300e-02 : f32
    %36 = vector.broadcast %cst_15 : f32 to vector<9x9xf32>
    %37 = arith.subf %35, %36 : vector<9x9xf32>
    %38 = arith.mulf %37, %33 : vector<9x9xf32>
    %cst_16 = arith.constant 1.801410e-01 : f32
    %39 = vector.broadcast %cst_16 : f32 to vector<9x9xf32>
    %40 = arith.addf %38, %39 : vector<9x9xf32>
    %41 = arith.mulf %40, %33 : vector<9x9xf32>
    %cst_17 = arith.constant 0.330299497 : f32
    %42 = vector.broadcast %cst_17 : f32 to vector<9x9xf32>
    %43 = arith.subf %41, %42 : vector<9x9xf32>
    %44 = arith.mulf %43, %33 : vector<9x9xf32>
    %cst_18 = arith.constant 9.998660e-01 : f32
    %45 = vector.broadcast %cst_18 : f32 to vector<9x9xf32>
    %46 = arith.addf %44, %45 : vector<9x9xf32>
    %47 = arith.mulf %46, %32 : vector<9x9xf32>
    %48 = arith.cmpf ogt, %20, %19 : vector<9x9xf32>
    %cst_19 = arith.constant 1.57079637 : f32
    %49 = vector.broadcast %cst_19 : f32 to vector<9x9xf32>
    %50 = arith.subf %49, %47 : vector<9x9xf32>
    %51 = arith.select %48, %50, %47 : vector<9x9xi1>, vector<9x9xf32>
    %cst_20 = arith.constant 0.000000e+00 : f32
    %52 = vector.broadcast %cst_20 : f32 to vector<9x9xf32>
    %53 = arith.cmpf olt, %10, %52 : vector<9x9xf32>
    %cst_21 = arith.constant 3.14159274 : f32
    %54 = vector.broadcast %cst_21 : f32 to vector<9x9xf32>
    %55 = arith.subf %54, %51 : vector<9x9xf32>
    %56 = arith.select %53, %55, %51 : vector<9x9xi1>, vector<9x9xf32>
    %57 = tpu.bitcast %11 : vector<9x9xf32> -> vector<9x9xi32>
    %c-2147483648_i32 = arith.constant -2147483648 : i32
    %58 = vector.broadcast %c-2147483648_i32 : i32 to vector<9x9xi32>
    %59 = arith.andi %57, %58 : vector<9x9xi32>
    %60 = tpu.bitcast %56 : vector<9x9xf32> -> vector<9x9xi32>
    %61 = arith.ori %60, %59 : vector<9x9xi32>
    %62 = tpu.bitcast %61 : vector<9x9xi32> -> vector<9x9xf32>
    %c0_22 = arith.constant 0 : index
    %c0_23 = arith.constant 0 : index
    %c0_24 = arith.constant 0 : index
    %63 = vector.load %arg6[%c0_22, %c0_23, %c0_24] : memref<1x9x9xf32, #tpu.memory_space<vmem>>, vector<1x9x9xf32>
    %64 = vector.shape_cast %63 : vector<1x9x9xf32> to vector<9x9xf32>
    %65 = vector.shape_cast %62 : vector<9x9xf32> to vector<1x9x9xf32>
    tpu.vector_store %arg6[%c0_22, %c0_23, %c0_24], %65 {strides = array<i32>} : memref<1x9x9xf32, #tpu.memory_space<vmem>>, vector<1x9x9xf32>,
    return
  }
  func.func @transform_0(%arg0: i32, %arg1: i32) -> (i32, i32, i32) {
    %c0_i32 = arith.constant 0 : i32
    %c0_i32_0 = arith.constant 0 : i32
    return %arg0, %c0_i32, %arg1 : i32, i32, i32
  }
  func.func @transform_1(%arg0: i32, %arg1: i32) -> (i32, i32, i32, i32) {
    %c0_i32 = arith.constant 0 : i32
    %c0_i32_0 = arith.constant 0 : i32
    %c0_i32_1 = arith.constant 0 : i32
    return %arg0, %arg1, %c0_i32, %c0_i32_0 : i32, i32, i32, i32
  }
  func.func @transform_2(%arg0: i32, %arg1: i32) -> (i32, i32) {
    %c0_i32 = arith.constant 0 : i32
    %c0_i32_0 = arith.constant 0 : i32
    %c0_i32_1 = arith.constant 0 : i32
    return %c0_i32, %c0_i32_0 : i32, i32
  }
  func.func @transform_3(%arg0: i32, %arg1: i32) -> (i32, i32, i32) {
    %c0_i32 = arith.constant 0 : i32
    %c0_i32_0 = arith.constant 0 : i32
    return %arg0, %c0_i32, %arg1 : i32, i32, i32
  }
  func.func @transform_4(%arg0: i32, %arg1: i32) -> (i32, i32, i32) {
    %c0_i32 = arith.constant 0 : i32
    %c0_i32_0 = arith.constant 0 : i32
    return %arg0, %c0_i32, %arg1 : i32, i32, i32
  }
}

</mosaic_0001>

<bundles_post_ra>
// kernel: tpu_custom_call.1
= control target key start
LH: loop header
LB: loop body
LE: loop exit
PB: predicated region body
PF: predicated region fallthrough
CT: control target
= control target key end

     0   :  { %s750_s15 = smov 0   ;;  %s752_s16 = smov 0   ;;  %s868_s0 = inlined_call_operand.vmem [shape: f32[2,8,9], index: 0, kind: input, shape index: {}]   ;;  %s869_s1 = inlined_call_operand.vmem [shape: f32[2,1,8,1], index: 1, kind: input, shape index: {}]   ;;  %s870_s2 = inlined_call_operand.vmem [shape: f32[32,16], index: 2, kind: input, shape index: {}]   ;;  %s871_s3 = inlined_call_operand.vmem [shape: f32[2,9,9], index: 3, kind: output, shape index: {0}]   ;;  %s872_s4 = inlined_call_operand.vmem [shape: f32[2,9,9], index: 4, kind: output, shape index: {1}]  }
   0x1   :  { %s754_s17 = smov 0  }
   0x2 LB: > { %s27_s18 = sadd.s32 1, %s717_s16  ;;  %p624_p0 = scmp.ge.s32.totalorder %s721_s17, 1  ;;  %s721_s17 = sphi %s754_s17, %s15_s17   ;;  %s717_s16 = sphi %s752_s16, %s874_s16   ;;  %s713_s15 = sphi %s750_s15, %s873_s15  }
   0x3   : > { %p29_p1 = scmp.ge.s32.totalorder %s27_s18, 2  ;;  %p199_p2 = scmp.lt.s32.totalorder %s721_s17, 3 }
   0x5   : > { %s876_s18 = smov (%p29_p1, %s27_s18), 0  ;;  %p200_p3 = pnand %p624_p0, %p199_p2 }
   0x6   : > { %p245_p4 = scmp.lt.s32.totalorder (!%p200_p3), %s713_s15, 1  ;;  %s723_s23 = smov (!%p200_p3), 9   ;;  %v287_v1 = vld [vmem:[%s870_s2] sm:$0xff] (!%p200_p3)  ;;  %vm291_vm0 = vcmask (!%p200_p3), 130048   ;;  %v289_v2 = vld [vmem:[%s870_s2 + $0x10] sm:$0xff] (!%p200_p3)  ;;  %vm281_vm1 = vcmask (!%p200_p3), 72704  }
   0x7   : > { %203 = sbr.rel (%p200_p3) target bundleno = 523 (0x20b), region = 32  ;;  %653 = vmatprep.mubr.msk.f32.mxu0 (!%p200_p3), %vm291_vm0, %v287_v1  ;;  %656 = vmatprep.mubr.msk.f32.mxu1 (!%p200_p3), %vm291_vm0, %v289_v2  ;;  %s724_s5 = smov (!%p200_p3), 127   ;;  %v288_v8 = vld [vmem:[%s870_s2 + $0x8] sm:$0xff] (!%p200_p3)  ;;  %v290_v9 = vld [vmem:[%s870_s2 + $0x18] sm:$0xff] (!%p200_p3)  ;;  %vm410_vm7 = vcmask (!%p200_p3), 65536  }
   0xe   : > { %s878_s15 = smov (!%p245_p4, %s713_s15), 1 }
   0xf   : > { %s625_s19 = sshll.u32 %s878_s15, 3  ;;  %s641_s10 = sshll.u32 %s878_s15, 4 }
  0x10   : > { %s258_s22 = scalar_lea.vmem %s869_s1, %s625_s19  ;;  %s251_s30 = scalar_lea.vmem %s868_s0, %s625_s19 }
  0x11   : > { %v276_v0 = vld [vmem:[%s258_s22] sm:$0xff]  ;;  %s266_s13 = scalar_lea.vmem %s871_s3, %s641_s10  ;;  %s274_s20 = scalar_lea.vmem %s872_s4, %s641_s10 }
  0x12   : > { %278 = vrot.lane.b32.xlu0 %v276_v0, %s723_s23  ;;  %v275_v3 = vld [vmem:[%s251_s30] sm:$0xff] }
  0x84   : > { %v279_v4 = vpop.permute.xlu0 %278 }
  0x85   : > { %v282_v5 = vsel %vm281_vm1, %v275_v3, %v279_v4 }
  0x86   : > { %284 = vrot.lane.b32.xlu0 %v282_v5, %s724_s5 }
  0xf8   : > { %v285_v6 = vpop.permute.xlu0 %284 }
  0xf9   : > { %v659_v7 = vpack.c.bf16 %v285_v6, %v282_v5 }
  0xfb   : > { %660 = vmatprep.subr.bf16.mxu0 %v659_v7  ;;  %663 = vmatprep.subr.bf16.mxu1 %v659_v7 }
  0xfc   : > { %662 = vmatpush3.bf16.msra.mxu0 %v659_v7  ;;  %664 = vmatpush3.bf16.msra.mxu1 %v659_v7 }
  0xff   : > { %654 = vmatmul.mubr.msk.f32.vlgmr.msra.gmra.mrb[0].mxu0 %vm291_vm0, %v288_v8  ;;  %657 = vmatmul.mubr.msk.f32.vlgmr.msra.gmra.mrb[0].mxu1 %vm291_vm0, %v290_v9 }
 0x1d2   : > { %v794_v10 = vpop.f32.mrb[0].mxu0  ;;  %v796_v11 = vpop.f32.mrb[0].mxu1 }
 0x1d3   : > { %v390_v12 = vmul.f32 %v794_v10, %v794_v10  ;;  %v801_v13 = vand.u32 2147483647, %v794_v10  ;;  %v392_v14 = vmul.f32 %v796_v11, %v796_v11  ;;  %v805_v15 = vpop.f32.mrb[1].mxu0  ;;  %v807_v16 = vpop.f32.mrb[1].mxu1  ;;  %v810_v17 = vand.u32 2147483647, %v796_v11 }
 0x1d4   : > { %v389_v18 = vmul.f32 %v805_v15, %v805_v15  ;;  %v815_v19 = vand.u32 2147483647, %v805_v15  ;;  %v391_v21 = vmul.f32 %v807_v16, %v807_v16  ;;  %v820_v22 = vand.u32 2147483647, %v807_v16 }
 0x1d5   : > { %v394_v20 = vadd.f32 %v392_v14, %v390_v12  ;;  %v417_v23 = vmax.f32 %v801_v13, %v810_v17  ;;  %v419_v24 = vmin.f32 %v801_v13, %v810_v17  ;;  %vm455_vm2 = vcmp.gt.f32.partialorder %v810_v17, %v801_v13 }
 0x1d6   : > { %v393_v25 = vadd.f32 %v391_v21, %v389_v18  ;;  %v416_v26 = vmax.f32 %v815_v19, %v820_v22  ;;  %v418_v27 = vmin.f32 %v815_v19, %v820_v22  ;;  %vm454_vm4 = vcmp.gt.f32.partialorder %v820_v22, %v815_v19 }
 0x1d7   : > { %691 = vrsqrt.f32 %v394_v20  ;;  %vm421_vm3 = vcmp.eq.f32.partialorder %v417_v23, 0.0  ;;  %vm404_vm6 = vcmp.eq.f32.partialorder %v394_v20, inf  ;;  %v407_v32 = vand.u32 2147483648, %v394_v20 }
 0x1d8   : > { %v423_v28 = vsel %vm421_vm3, 1.0, %v417_v23  ;;  %vm420_vm5 = vcmp.eq.f32.partialorder %v416_v26, 0.0  ;;  %vm406_vm8 = vcmp.eq.f32.partialorder %v394_v20, 0.0  ;;  %vm397_vm9 = vcmp.eq.f32.partialorder %v393_v25, inf }
 0x1d9   : > { %693 = vrcp.f32 %v423_v28  ;;  %v422_v29 = vsel %vm420_vm5, 1.0, %v416_v26  ;;  %v400_v41 = vand.u32 2147483648, %v393_v25  ;;  %vm399_vm10 = vcmp.eq.f32.partialorder %v393_v25, 0.0 }
 0x1da   : > { %695 = vrsqrt.f32 %v393_v25  ;;  %vm461_vm11 = vcmp.lt.f32.partialorder %v794_v10, 0.0  ;;  %v469_v12 = vand.u32 2147483648, %v796_v11  ;;  %vm460_vm12 = vcmp.lt.f32.partialorder %v805_v15, 0.0 }
 0x1db   : > { %697 = vrcp.f32 %v422_v29  ;;  %v468_v13 = vand.u32 2147483648, %v807_v16 }
 0x1e1   : > { %v692_v30 = vpop.eup %691 }
 0x1e2   : > { %v403_v31 = vmul.f32 %v692_v30, %v394_v20 }
 0x1e3   : > { %v694_v33 = vpop.eup %693 }
 0x1e4   : > { %v405_v34 = vsel %vm404_vm6, %v394_v20, %v403_v31  ;;  %v696_v35 = vpop.eup %695  ;;  %v427_v37 = vmul.f32 %v694_v33, %v423_v28 }
 0x1e5   : > { %v408_v36 = vsel %vm406_vm8, %v407_v32, %v405_v34  ;;  %v396_v38 = vmul.f32 %v696_v35, %v393_v25  ;;  %v698_v39 = vpop.eup %697 }
 0x1e6   : > { %411 = vst.msk [vmem:[%s266_s13 + $0x8] sm:$0x1] %vm410_vm7, %v408_v36  ;;  %v429_v40 = vsub.f32 2.0, %v427_v37  ;;  %v426_v43 = vmul.f32 %v698_v39, %v422_v29 }
 0x1e7   : > { %v398_v42 = vsel %vm397_vm9, %v393_v25, %v396_v38 }
 0x1e8   : > { %v431_v44 = vmul.f32 %v694_v33, %v429_v40  ;;  %v401_v45 = vsel %vm399_vm10, %v400_v41, %v398_v42  ;;  %v428_v46 = vsub.f32 2.0, %v426_v43 }
 0x1e9   : > { %409 = vst.msk [vmem:[%s266_s13] sm:$0xff] %vm281_vm1, %v401_v45 }
 0x1ea   : > { %v433_v47 = vmul.f32 %v431_v44, %v419_v24  ;;  %v430_v48 = vmul.f32 %v698_v39, %v428_v46 }
 0x1ec   : > { %v435_v49 = vmul.f32 %v433_v47, %v433_v47  ;;  %v432_v50 = vmul.f32 %v430_v48, %v418_v27 }
 0x1ee   : > { %v437_v51 = vmul.f32 0.0208351, %v435_v49  ;;  %v434_v52 = vmul.f32 %v432_v50, %v432_v50 }
 0x1f0   : > { %v636_v53 = vadd.f32 -0.085133, %v437_v51  ;;  %v436_v54 = vmul.f32 0.0208351, %v434_v52 }
 0x1f2   : > { %v441_v55 = vmul.f32 %v636_v53, %v435_v49  ;;  %v635_v56 = vadd.f32 -0.085133, %v436_v54 }
 0x1f4   : > { %v443_v57 = vadd.f32 0.180141, %v441_v55  ;;  %v440_v58 = vmul.f32 %v635_v56, %v434_v52 }
 0x1f6   : > { %v445_v59 = vmul.f32 %v443_v57, %v435_v49  ;;  %v442_v60 = vadd.f32 0.180141, %v440_v58 }
 0x1f8   : > { %v638_v61 = vadd.f32 -0.3302995, %v445_v59  ;;  %v444_v62 = vmul.f32 %v442_v60, %v434_v52 }
 0x1fa   : > { %v449_v63 = vmul.f32 %v638_v61, %v435_v49  ;;  %v637_v0 = vadd.f32 -0.3302995, %v444_v62 }
 0x1fc   : > { %v451_v1 = vadd.f32 0.999866, %v449_v63  ;;  %v448_v2 = vmul.f32 %v637_v0, %v434_v52 }
 0x1fe   : > { %v453_v3 = vmul.f32 %v451_v1, %v433_v47  ;;  %v450_v4 = vadd.f32 0.999866, %v448_v2 }
 0x200   : > { %v457_v5 = vsub.f32 1.5707964, %v453_v3  ;;  %v452_v6 = vmul.f32 %v450_v4, %v432_v50 }
 0x202   : > { %v459_v7 = vsel %vm455_vm2, %v457_v5, %v453_v3  ;;  %v456_v9 = vsub.f32 1.5707964, %v452_v6 }
 0x203   : > { %v463_v8 = vsub.f32 3.1415927, %v459_v7 }
 0x204   : > { %v458_v18 = vsel %vm454_vm4, %v456_v9, %v452_v6 }
 0x205   : > { %v465_v14 = vsel %vm461_vm11, %v463_v8, %v459_v7  ;;  %v462_v21 = vsub.f32 3.1415927, %v458_v18 }
 0x206   : > { %v473_v20 = vor.u32 %v469_v12, %v465_v14 }
 0x207   : > { %v464_v10 = vsel %vm460_vm12, %v462_v21, %v458_v18 }
 0x208   : > { %477 = vst.msk [vmem:[%s274_s20 + $0x8] sm:$0x1] %vm410_vm7, %v473_v20  ;;  %v472_v11 = vor.u32 %v468_v13, %v464_v10 }
 0x20a   : > { %476 = vst.msk [vmem:[%s274_s20] sm:$0xff] %vm281_vm1, %v472_v11 }
 0x20b PF: > { %s15_s17 = sadd.s32 1, %s721_s17   ;;  %s873_s15 = smov %s717_s16 }
 0x20c   : > { %p12_p5 = scmp.ge.s32.totalorder %s15_s17, 4   ;;  %s874_s16 = smov %s876_s18 }
 0x20e   :  { %14 = sbr.rel (!%p12_p5) target bundleno = 2 (0x2), region = 77 }

</bundles_post_ra>
